<compile_context>
chip_gen: v7x
topology: tpu7x:2x2x1
jax: 0.10.0
libtpu: 0.0.40
codegen_flags: <defaults>
</compile_context>

<pallas_src>
import jax
import jax.numpy as jnp
import numpy as np
from jax.experimental import pallas as pl
from jax.experimental.pallas import tpu as pltpu


def conv_relu_kernel(x_ref, t_ref, b_ref, o_ref):
    # x_ref: (bn, H+2, (W+2)*Cin)   padded input rows, bf16      (pipelined)
    # t_ref: (3, (W+2)*Cin, W*Cout) per-dy banded weights, bf16  (grid-invariant)
    # b_ref: (1, W*Cout)            bias broadcast over width, f32 (grid-invariant)
    # o_ref: (bn, H, W*Cout)        lane-dense output rows
    bn, hp2, _ = x_ref.shape
    h = hp2 - 2
    x = x_ref[...]
    t = t_ref[...]
    bias = b_ref[...]
    for b in range(bn):                       # static unroll over images in the tile
        acc = jnp.dot(x[b, 0:h, :], t[0], preferred_element_type=jnp.float32)
        for dy in (1, 2):
            acc = acc + jnp.dot(x[b, dy:dy + h, :], t[dy],
                                preferred_element_type=jnp.float32)
        o_ref[b] = jnp.maximum(acc + bias, 0.0).astype(o_ref.dtype)


def _tensorcores_per_chip():
    """Best-effort TensorCores per chip: v7x = 2, v5e/v6e = 1 (safe fallback 1)."""
    try:
        kind = jax.devices()[0].device_kind.lower()
    except Exception:
        return 1
    return 2 if ("v7" in kind or "7x" in kind) else 1


def conv_relu(x_nchw, weight, bias, *, batch_tile=None, compute_dtype=jnp.bfloat16):
    """ConvRelu forward. x_nchw: (N, Cin, H, W); weight: (Cout, Cin, 3, 3); bias: (Cout,)."""
    N, Cin, H, W = x_nchw.shape
    Cout = weight.shape[0]
    out_dtype = x_nchw.dtype
    out_bytes = jnp.dtype(out_dtype).itemsize
    Krow = (W + 2) * Cin
    WCout = W * Cout
    # Note: when WCout is not a multiple of 128 the output stores become
    # lane-masked (perf cliff only, not a correctness issue).

    # ---- NCHW -> NHWC boundary (required by the module's interface), zero pad,
    # ---- flatten (w, ci) into lanes.  Single fused pass under jit; no dy copy.
    # TODO(synk): if the surrounding model kept activations NHWC, this transpose
    # and the final one below would disappear entirely.
    x = jnp.transpose(x_nchw, (0, 2, 3, 1))                    # (N, H, W, Cin)
    xp = jnp.pad(x, ((0, 0), (1, 1), (1, 1), (0, 0)))          # (N, H+2, W+2, Cin)
    xp = xp.reshape(N, H + 2, Krow).astype(compute_dtype)

    # ---- per-dy banded weight matrices: T[dy, (wp, ci), (w, co)] ----
    # T[dy, wp, ci, w, co] = weight[co, ci, dy, wp - w] for 0 <= wp - w <= 2 else 0
    w_t = jnp.transpose(weight, (2, 3, 1, 0)).astype(jnp.float32)        # (dy, dx, ci, co)
    shift = jnp.stack(
        [jnp.eye(W + 2, W, k=-dx, dtype=jnp.float32) for dx in range(3)], axis=0
    )                                                                     # (dx, wp, w)
    T = jnp.einsum("xpw,yxio->ypiwo", shift, w_t)                         # (dy, wp, ci, w, co)
    T = T.reshape(3, Krow, WCout).astype(compute_dtype)

    # bias broadcast over width -> one value per output lane, kept in f32
    b = jnp.tile(bias.astype(jnp.float32), W).reshape(1, WCout)

    # ---- batch tiling: one fat step on 1-TC chips, split across TCs on v7x ----
    if batch_tile is None:
        cores = _tensorcores_per_chip()
        target_steps = min(N, cores) if N > 0 else 1
        batch_tile = pl.cdiv(N, target_steps)
        # keep the double-buffered in/out blocks within a modest VMEM slice
        per_image = (H + 2) * Krow * 2 + H * WCout * out_bytes
        max_bn = max(1, (8 << 20) // (2 * per_image))
        batch_tile = max(1, min(batch_tile, max_bn))
    bn = batch_tile
    grid = pl.cdiv(N, bn)
    Np = grid * bn
    if Np != N:
        xp = jnp.pad(xp, ((0, Np - N), (0, 0), (0, 0)))

    cost = pl.CostEstimate(
        flops=2 * N * H * W * Cout * 9 * Cin,
        transcendentals=0,
        bytes_accessed=int(
            Np * (H + 2) * Krow * 2          # padded input read (bf16)
            + 3 * Krow * WCout * 2           # banded weights (bf16)
            + WCout * 4                      # bias (f32)
            + Np * H * WCout * out_bytes     # output write
        ),
    )

    out = pl.pallas_call(
        conv_relu_kernel,
        out_shape=jax.ShapeDtypeStruct((Np, H, WCout), out_dtype),
        grid_spec=pltpu.PrefetchScalarGridSpec(
            num_scalar_prefetch=0,
            grid=(grid,),
            in_specs=[
                pl.BlockSpec((bn, H + 2, Krow), lambda i: (i, 0, 0)),
                pl.BlockSpec((3, Krow, WCout), lambda i: (0, 0, 0)),   # grid-invariant
                pl.BlockSpec((1, WCout), lambda i: (0, 0)),            # grid-invariant
            ],
            out_specs=pl.BlockSpec((bn, H, WCout), lambda i: (i, 0, 0)),
        ),
        compiler_params=pltpu.CompilerParams(
            dimension_semantics=("parallel",),
            vmem_limit_bytes=32 * 1024 * 1024,
        ),
        cost_estimate=cost,
    )(xp, T, b)

    out = out[:N].reshape(N, H, W, Cout)
    return jnp.transpose(out, (0, 3, 1, 2))                    # back to NCHW


if __name__ == "__main__":
    # ConvRelu(in_=4, out=8); input (batch=2, channels=4, spatial=16x16)
    in_, out_ = 4, 8
    N, H, W = 2, 16, 16

    key = jax.random.PRNGKey(0)
    kx, kw, kb = jax.random.split(key, 3)
    x = jax.random.normal(kx, (N, in_, H, W), dtype=jnp.float32)
    # Deterministic synthetic params (PyTorch-default-like uniform fan-in scale).
    fan_in = in_ * 3 * 3
    bound = 1.0 / np.sqrt(fan_in)
    weight = jax.random.uniform(kw, (out_, in_, 3, 3), jnp.float32, -bound, bound)
    bias = jax.random.uniform(kb, (out_,), jnp.float32, -bound, bound)

    conv_relu_fn = jax.jit(conv_relu)   # fuses the boundary transpose/pad/cast passes
    y = jax.block_until_ready(conv_relu_fn(x, weight, bias))

    # Reference check against XLA conv + relu.
    ref = jax.lax.conv_general_dilated(
        x, weight, window_strides=(1, 1), padding=((1, 1), (1, 1)),
        dimension_numbers=("NCHW", "OIHW", "NCHW"),
    ) + bias.reshape(1, -1, 1, 1)
    ref = jnp.maximum(ref, 0.0)
    assert y.shape == (N, out_, H, W)
    # bf16 MXU operands (f32 accumulation) -> loosened tolerance vs f32 reference.
    assert np.allclose(np.asarray(y), np.asarray(ref), atol=5e-2, rtol=5e-2)

    print("KERNEL_OK")
</pallas_src>

<mosaic_0001>
module attributes {stable_mosaic.version = 11 : i64} {
  func.func @conv_relu_kernel(%arg0: i32, %arg1: memref<2x18x72xbf16, #tpu.memory_space<vmem>>, %arg2: memref<3x72x128xbf16, #tpu.memory_space<vmem>>, %arg3: memref<1x128xf32, #tpu.memory_space<vmem>>, %arg4: memref<2x16x128xf32, #tpu.memory_space<vmem>>) attributes {dimension_semantics = [#tpu.dimension_semantics<parallel>], iteration_bounds = array<i64: 1>, scalar_prefetch = 0 : i64, scratch_operands = 0 : i64, tpu.core_type = #tpu.core_type<tc>, window_params = [{transform_indices = @transform_0, window_bounds = array<i64: 2, 18, 72>}, {pipeline_mode = #tpu.pipeline_mode<synchronous>, transform_indices = @transform_1, window_bounds = array<i64: 3, 72, 128>}, {pipeline_mode = #tpu.pipeline_mode<synchronous>, transform_indices = @transform_2, window_bounds = array<i64: 1, 128>}, {transform_indices = @transform_3, window_bounds = array<i64: 2, 16, 128>}]} {
    %c0 = arith.constant 0 : index
    %c0_0 = arith.constant 0 : index
    %c0_1 = arith.constant 0 : index
    %0 = vector.load %arg1[%c0, %c0_0, %c0_1] : memref<2x18x72xbf16, #tpu.memory_space<vmem>>, vector<2x18x72xbf16>
    %c0_2 = arith.constant 0 : index
    %c0_3 = arith.constant 0 : index
    %c0_4 = arith.constant 0 : index
    %1 = vector.load %arg2[%c0_2, %c0_3, %c0_4] : memref<3x72x128xbf16, #tpu.memory_space<vmem>>, vector<3x72x128xbf16>
    %c0_5 = arith.constant 0 : index
    %c0_6 = arith.constant 0 : index
    %2 = vector.load %arg3[%c0_5, %c0_6] : memref<1x128xf32, #tpu.memory_space<vmem>>, vector<1x128xf32>
    %3 = vector.extract_strided_slice %0 {offsets = [0, 0, 0], sizes = [1, 16, 72], strides = [1, 1, 1]} : vector<2x18x72xbf16> to vector<1x16x72xbf16>
    %4 = vector.shape_cast %3 : vector<1x16x72xbf16> to vector<16x72xbf16>
    %5 = vector.extract_strided_slice %1 {offsets = [0, 0, 0], sizes = [1, 72, 128], strides = [1, 1, 1]} : vector<3x72x128xbf16> to vector<1x72x128xbf16>
    %6 = vector.shape_cast %5 : vector<1x72x128xbf16> to vector<72x128xbf16>
    %cst = arith.constant dense<0.000000e+00> : vector<16x128xf32>
    %7 = tpu.matmul %4, %6, %cst {dimension_numbers = #tpu.dot_dimension_numbers<[1], [0], [0], [1], [0, 0, 1, 1], [], []>} : vector<16x72xbf16>, vector<72x128xbf16>, vector<16x128xf32> -> vector<16x128xf32>
    %8 = vector.extract_strided_slice %0 {offsets = [0, 1, 0], sizes = [1, 16, 72], strides = [1, 1, 1]} : vector<2x18x72xbf16> to vector<1x16x72xbf16>
    %9 = vector.shape_cast %8 : vector<1x16x72xbf16> to vector<16x72xbf16>
    %10 = vector.extract_strided_slice %1 {offsets = [1, 0, 0], sizes = [1, 72, 128], strides = [1, 1, 1]} : vector<3x72x128xbf16> to vector<1x72x128xbf16>
    %11 = vector.shape_cast %10 : vector<1x72x128xbf16> to vector<72x128xbf16>
    %cst_7 = arith.constant dense<0.000000e+00> : vector<16x128xf32>
    %12 = tpu.matmul %9, %11, %cst_7 {dimension_numbers = #tpu.dot_dimension_numbers<[1], [0], [0], [1], [0, 0, 1, 1], [], []>} : vector<16x72xbf16>, vector<72x128xbf16>, vector<16x128xf32> -> vector<16x128xf32>
    %13 = arith.addf %7, %12 : vector<16x128xf32>
    %14 = vector.extract_strided_slice %0 {offsets = [0, 2, 0], sizes = [1, 16, 72], strides = [1, 1, 1]} : vector<2x18x72xbf16> to vector<1x16x72xbf16>
    %15 = vector.shape_cast %14 : vector<1x16x72xbf16> to vector<16x72xbf16>
    %16 = vector.extract_strided_slice %1 {offsets = [2, 0, 0], sizes = [1, 72, 128], strides = [1, 1, 1]} : vector<3x72x128xbf16> to vector<1x72x128xbf16>
    %17 = vector.shape_cast %16 : vector<1x72x128xbf16> to vector<72x128xbf16>
    %cst_8 = arith.constant dense<0.000000e+00> : vector<16x128xf32>
    %18 = tpu.matmul %15, %17, %cst_8 {dimension_numbers = #tpu.dot_dimension_numbers<[1], [0], [0], [1], [0, 0, 1, 1], [], []>} : vector<16x72xbf16>, vector<72x128xbf16>, vector<16x128xf32> -> vector<16x128xf32>
    %19 = arith.addf %13, %18 : vector<16x128xf32>
    %20 = vector.broadcast %2 : vector<1x128xf32> to vector<16x128xf32>
    %21 = arith.addf %19, %20 : vector<16x128xf32>
    %cst_9 = arith.constant 0.000000e+00 : f32
    %22 = vector.broadcast %cst_9 : f32 to vector<16x128xf32>
    %23 = arith.maximumf %21, %22 : vector<16x128xf32>
    %c0_10 = arith.constant 0 : index
    %c0_11 = arith.constant 0 : index
    %c0_12 = arith.constant 0 : index
    %24 = vector.load %arg4[%c0_10, %c0_11, %c0_12] : memref<2x16x128xf32, #tpu.memory_space<vmem>>, vector<1x16x128xf32>
    %25 = vector.shape_cast %24 : vector<1x16x128xf32> to vector<16x128xf32>
    %26 = vector.shape_cast %23 : vector<16x128xf32> to vector<1x16x128xf32>
    tpu.vector_store %arg4[%c0_10, %c0_11, %c0_12], %26 {strides = array<i32>} : memref<2x16x128xf32, #tpu.memory_space<vmem>>, vector<1x16x128xf32>,
    %27 = vector.extract_strided_slice %0 {offsets = [1, 0, 0], sizes = [1, 16, 72], strides = [1, 1, 1]} : vector<2x18x72xbf16> to vector<1x16x72xbf16>
    %28 = vector.shape_cast %27 : vector<1x16x72xbf16> to vector<16x72xbf16>
    %29 = vector.extract_strided_slice %1 {offsets = [0, 0, 0], sizes = [1, 72, 128], strides = [1, 1, 1]} : vector<3x72x128xbf16> to vector<1x72x128xbf16>
    %30 = vector.shape_cast %29 : vector<1x72x128xbf16> to vector<72x128xbf16>
    %cst_13 = arith.constant dense<0.000000e+00> : vector<16x128xf32>
    %31 = tpu.matmul %28, %30, %cst_13 {dimension_numbers = #tpu.dot_dimension_numbers<[1], [0], [0], [1], [0, 0, 1, 1], [], []>} : vector<16x72xbf16>, vector<72x128xbf16>, vector<16x128xf32> -> vector<16x128xf32>
    %32 = vector.extract_strided_slice %0 {offsets = [1, 1, 0], sizes = [1, 16, 72], strides = [1, 1, 1]} : vector<2x18x72xbf16> to vector<1x16x72xbf16>
    %33 = vector.shape_cast %32 : vector<1x16x72xbf16> to vector<16x72xbf16>
    %34 = vector.extract_strided_slice %1 {offsets = [1, 0, 0], sizes = [1, 72, 128], strides = [1, 1, 1]} : vector<3x72x128xbf16> to vector<1x72x128xbf16>
    %35 = vector.shape_cast %34 : vector<1x72x128xbf16> to vector<72x128xbf16>
    %cst_14 = arith.constant dense<0.000000e+00> : vector<16x128xf32>
    %36 = tpu.matmul %33, %35, %cst_14 {dimension_numbers = #tpu.dot_dimension_numbers<[1], [0], [0], [1], [0, 0, 1, 1], [], []>} : vector<16x72xbf16>, vector<72x128xbf16>, vector<16x128xf32> -> vector<16x128xf32>
    %37 = arith.addf %31, %36 : vector<16x128xf32>
    %38 = vector.extract_strided_slice %0 {offsets = [1, 2, 0], sizes = [1, 16, 72], strides = [1, 1, 1]} : vector<2x18x72xbf16> to vector<1x16x72xbf16>
    %39 = vector.shape_cast %38 : vector<1x16x72xbf16> to vector<16x72xbf16>
    %40 = vector.extract_strided_slice %1 {offsets = [2, 0, 0], sizes = [1, 72, 128], strides = [1, 1, 1]} : vector<3x72x128xbf16> to vector<1x72x128xbf16>
    %41 = vector.shape_cast %40 : vector<1x72x128xbf16> to vector<72x128xbf16>
    %cst_15 = arith.constant dense<0.000000e+00> : vector<16x128xf32>
    %42 = tpu.matmul %39, %41, %cst_15 {dimension_numbers = #tpu.dot_dimension_numbers<[1], [0], [0], [1], [0, 0, 1, 1], [], []>} : vector<16x72xbf16>, vector<72x128xbf16>, vector<16x128xf32> -> vector<16x128xf32>
    %43 = arith.addf %37, %42 : vector<16x128xf32>
    %44 = vector.broadcast %2 : vector<1x128xf32> to vector<16x128xf32>
    %45 = arith.addf %43, %44 : vector<16x128xf32>
    %cst_16 = arith.constant 0.000000e+00 : f32
    %46 = vector.broadcast %cst_16 : f32 to vector<16x128xf32>
    %47 = arith.maximumf %45, %46 : vector<16x128xf32>
    %c1 = arith.constant 1 : index
    %c0_17 = arith.constant 0 : index
    %c0_18 = arith.constant 0 : index
    %48 = vector.load %arg4[%c1, %c0_17, %c0_18] : memref<2x16x128xf32, #tpu.memory_space<vmem>>, vector<1x16x128xf32>
    %49 = vector.shape_cast %48 : vector<1x16x128xf32> to vector<16x128xf32>
    %50 = vector.shape_cast %47 : vector<16x128xf32> to vector<1x16x128xf32>
    tpu.vector_store %arg4[%c1, %c0_17, %c0_18], %50 {strides = array<i32>} : memref<2x16x128xf32, #tpu.memory_space<vmem>>, vector<1x16x128xf32>,
    return
  }
  func.func @transform_0(%arg0: i32) -> (i32, i32, i32) {
    %c0_i32 = arith.constant 0 : i32
    %c0_i32_0 = arith.constant 0 : i32
    %c0_i32_1 = arith.constant 0 : i32
    return %arg0, %c0_i32, %c0_i32_0 : i32, i32, i32
  }
  func.func @transform_1(%arg0: i32) -> (i32, i32, i32) {
    %c0_i32 = arith.constant 0 : i32
    %c0_i32_0 = arith.constant 0 : i32
    %c0_i32_1 = arith.constant 0 : i32
    %c0_i32_2 = arith.constant 0 : i32
    return %c0_i32, %c0_i32_0, %c0_i32_1 : i32, i32, i32
  }
  func.func @transform_2(%arg0: i32) -> (i32, i32) {
    %c0_i32 = arith.constant 0 : i32
    %c0_i32_0 = arith.constant 0 : i32
    %c0_i32_1 = arith.constant 0 : i32
    return %c0_i32, %c0_i32_0 : i32, i32
  }
  func.func @transform_3(%arg0: i32) -> (i32, i32, i32) {
    %c0_i32 = arith.constant 0 : i32
    %c0_i32_0 = arith.constant 0 : i32
    %c0_i32_1 = arith.constant 0 : i32
    return %arg0, %c0_i32, %c0_i32_0 : i32, i32, i32
  }
}

</mosaic_0001>

<bundles_post_ra>
// kernel: tile.8
= control target key start
LH: loop header
LB: loop body
LE: loop exit
PB: predicated region body
PF: predicated region fallthrough
CT: control target
= control target key end

     0   :  { %s28_s0 = inlined_call_operand.vmem [shape: f32[8], index: 0, kind: input, shape index: {}]   ;;  %s29_s1 = inlined_call_operand.vmem [shape: f32[16,8], index: 1, kind: output, shape index: {}]  }
   0x1   :  { %v4_v0 = vld [vmem:[%s28_s0] ss:$0 sm:$0xff] }
   0x2   :  { %5 = vst [vmem:[%s29_s1] sm:$0xff] %v4_v0  ;;  %8 = vst [vmem:[%s29_s1 + $0x8] sm:$0xff] %v4_v0 }

// kernel: tile.9
= control target key start
LH: loop header
LB: loop body
LE: loop exit
PB: predicated region body
PF: predicated region fallthrough
CT: control target
= control target key end

     0   :  { %s131_s10 = smov 120   ;;  %s132_s11 = smov 104   ;;  %vm3_vm0 = vcmask 64512   ;;  %vm9_vm1 = vcmask 1048512   ;;  %vm15_vm2 = vcmask 982912   ;;  %vm21_vm3 = vcmask 917312   ;;  %s207_s0 = inlined_call_operand.vmem [shape: f32[16,8], index: 0, kind: input, shape index: {}]   ;;  %s208_s1 = inlined_call_operand.vmem [shape: f32[1,128], index: 1, kind: output, shape index: {}]  }
   0x1   :  { %v101_v0 = vld [vmem:[%s207_s0 + $0xf] sm:$0x1]   ;;  %v103_v1 = vld [vmem:[%s207_s0 + $0xd] sm:$0x1]   ;;  %v102_v2 = vld [vmem:[%s207_s0 + $0xe] sm:$0x1]  }
   0x2   :  { %7 = vrot.lane.b32.xlu0 %v101_v0, %s131_s10  ;;  %19 = vrot.lane.b32.xlu1 %v103_v1, %s132_s11  ;;  %v104_v3 = vld [vmem:[%s207_s0 + $0xc] sm:$0x1]   ;;  %s133_s16 = smov 112   ;;  %s134_s17 = smov 96   ;;  %v105_v4 = vld [vmem:[%s207_s0 + $0xb] sm:$0x1]  }
   0x3   :  { %v106_v5 = vld [vmem:[%s207_s0 + $0xa] sm:$0x1]   ;;  %v2_v6 = vld [vmem:[%s207_s0] sm:$0x1]   ;;  %s135_s24 = smov 88   ;;  %s136_s25 = smov 80  }
   0x4   :  { %4 = vst.msk [vmem:[#allocation0] sm:$0x1] %vm3_vm0, %v2_v6   ;;  %v107_v7 = vld [vmem:[%s207_s0 + $0x9] sm:$0x1]   ;;  %v108_v8 = vld [vmem:[%s207_s0 + $0x8] sm:$0x1]  }
   0x5   :  { %s137_s30 = smov 72   ;;  %s138_s2 = smov 64   ;;  %v109_v9 = vld [vmem:[%s207_s0 + $0x7] sm:$0x1]   ;;  %v110_v10 = vld [vmem:[%s207_s0 + $0x6] sm:$0x1]  }
   0x6   :  { %13 = vrot.lane.b32.xlu0 %v102_v2, %s133_s16  ;;  %25 = vrot.lane.b32.xlu1 %v104_v3, %s134_s17  ;;  %s139_s7 = smov 56   ;;  %s140_s8 = smov 48   ;;  %v111_v11 = vld [vmem:[%s207_s0 + $0x5] sm:$0x1]   ;;  %v112_v12 = vld [vmem:[%s207_s0 + $0x4] sm:$0x1]  }
   0x7   :  { %s141_s13 = smov 40   ;;  %s142_s14 = smov 32   ;;  %v113_v13 = vld [vmem:[%s207_s0 + $0x3] sm:$0x1]   ;;  %v114_v14 = vld [vmem:[%s207_s0 + $0x2] sm:$0x1]  }
   0x8   :  { %s143_s19 = smov 24   ;;  %s144_s20 = smov 16   ;;  %v115_v15 = vld [vmem:[%s207_s0 + $0x1] sm:$0x1]   ;;  %vm27_vm4 = vcmask 851712   ;;  %vm33_vm5 = vcmask 786112  }
   0x9   :  { %s145_s0 = smov 8   ;;  %vm39_vm6 = vcmask 720512   ;;  %vm45_vm7 = vcmask 654912   ;;  %vm51_vm8 = vcmask 589312   ;;  %vm57_vm9 = vcmask 523712  }
   0xa   :  { %31 = vrot.lane.b32.xlu0 %v105_v4, %s135_s24  ;;  %37 = vrot.lane.b32.xlu1 %v106_v5, %s136_s25  ;;  %vm63_vm10 = vcmask 458112   ;;  %vm69_vm11 = vcmask 392512   ;;  %vm75_vm12 = vcmask 326912   ;;  %vm81_vm13 = vcmask 261312  }
   0xb   :  { %vm87_vm14 = vcmask 195712   ;;  %vm93_vm15 = vcmask 130112  }
   0xe   :  { %43 = vrot.lane.b32.xlu0 %v107_v7, %s137_s30  ;;  %49 = vrot.lane.b32.xlu1 %v108_v8, %s138_s2 }
  0x12   :  { %55 = vrot.lane.b32.xlu0 %v109_v9, %s139_s7  ;;  %61 = vrot.lane.b32.xlu1 %v110_v10, %s140_s8 }
  0x16   :  { %67 = vrot.lane.b32.xlu0 %v111_v11, %s141_s13  ;;  %73 = vrot.lane.b32.xlu1 %v112_v12, %s142_s14 }
  0x1a   :  { %79 = vrot.lane.b32.xlu0 %v113_v13, %s143_s19  ;;  %85 = vrot.lane.b32.xlu1 %v114_v14, %s144_s20 }
  0x1e   :  { %91 = vrot.lane.b32.xlu0 %v115_v15, %s145_s0 }
  0x74   :  { %v8_v16 = vpop.permute.xlu0 %7   ;;  %v20_v17 = vpop.permute.xlu1 %19  }
  0x75   :  { %10 = vst.msk [vmem:[#allocation0] sm:$0x1] %vm9_vm1, %v8_v16  }
  0x78   :  { %v14_v18 = vpop.permute.xlu0 %13   ;;  %v26_v19 = vpop.permute.xlu1 %25  }
  0x79   :  { %16 = vst.msk [vmem:[#allocation0] sm:$0x1] %vm15_vm2, %v14_v18  }
  0x7a   :  { %22 = vst.msk [vmem:[#allocation0] sm:$0x1] %vm21_vm3, %v20_v17  }
  0x7b   :  { %28 = vst.msk [vmem:[#allocation0] sm:$0x1] %vm27_vm4, %v26_v19  }
  0x7c   :  { %v32_v20 = vpop.permute.xlu0 %31   ;;  %v38_v21 = vpop.permute.xlu1 %37  }
  0x7d   :  { %34 = vst.msk [vmem:[#allocation0] sm:$0x1] %vm33_vm5, %v32_v20  }
  0x7e   :  { %40 = vst.msk [vmem:[#allocation0] sm:$0x1] %vm39_vm6, %v38_v21  }
  0x80   :  { %v44_v22 = vpop.permute.xlu0 %43   ;;  %v50_v23 = vpop.permute.xlu1 %49  }
  0x81   :  { %46 = vst.msk [vmem:[#allocation0] sm:$0x1] %vm45_vm7, %v44_v22  }
  0x82   :  { %52 = vst.msk [vmem:[#allocation0] sm:$0x1] %vm51_vm8, %v50_v23  }
  0x84   :  { %v56_v24 = vpop.permute.xlu0 %55   ;;  %v62_v25 = vpop.permute.xlu1 %61  }
  0x85   :  { %58 = vst.msk [vmem:[#allocation0] sm:$0x1] %vm57_vm9, %v56_v24  }
  0x86   :  { %64 = vst.msk [vmem:[#allocation0] sm:$0x1] %vm63_vm10, %v62_v25  }
  0x88   :  { %v68_v26 = vpop.permute.xlu0 %67   ;;  %v74_v27 = vpop.permute.xlu1 %73  }
  0x89   :  { %70 = vst.msk [vmem:[#allocation0] sm:$0x1] %vm69_vm11, %v68_v26  }
  0x8a   :  { %76 = vst.msk [vmem:[#allocation0] sm:$0x1] %vm75_vm12, %v74_v27  }
  0x8c   :  { %v80_v28 = vpop.permute.xlu0 %79   ;;  %v86_v29 = vpop.permute.xlu1 %85  }
  0x8d   :  { %82 = vst.msk [vmem:[#allocation0] sm:$0x1] %vm81_vm13, %v80_v28  }
  0x8e   :  { %88 = vst.msk [vmem:[#allocation0] sm:$0x1] %vm87_vm14, %v86_v29  }
  0x90   :  { %v92_v30 = vpop.permute.xlu0 %91  }
  0x91   :  { %94 = vst.msk [vmem:[#allocation0] sm:$0x1] %vm93_vm15, %v92_v30  }
  0x98   :  { %v98_v31 = vld [vmem:[#allocation0] sm:$0x1] }
  0x99   :  { %100 = vst [vmem:[%s208_s1] sm:$0x1] %v98_v31 }

// kernel: conv_relu.1
= control target key start
LH: loop header
LB: loop body
LE: loop exit
PB: predicated region body
PF: predicated region fallthrough
CT: control target
= control target key end

     0   :  { %v647_v0 = vmov 0.0   ;;  %vm648_vm0 = vmmov 0   ;;  %vm57_vm1 = vsmask.f32 7424  ;;  %vm101_vm2 = vcmask 1043456   ;;  %s822_s1 = inlined_call_operand.vmem [shape: bf16[3,72,128], index: 1, kind: input, shape index: {}]   ;;  %s823_s0 = inlined_call_operand.vmem [shape: bf16[2,18,72], index: 0, kind: input, shape index: {}]   ;;  %s824_s2 = inlined_call_operand.vmem [shape: f32[1,128], index: 2, kind: input, shape index: {}]   ;;  %s825_s3 = inlined_call_operand.vmem [shape: f32[2,16,128], index: 3, kind: output, shape index: {}]  }
   0x1   :  { %542 = vmatprep.subr.bf16.mxu0 %v647_v0  ;;  %556 = vmatprep.subr.bf16.mxu1 %v647_v0  ;;  %v628_v1 = vld [vmem:[%s822_s1 + $0x24] sm:$0xff]   ;;  %v630_v3 = vld [vmem:[%s822_s1 + $0x2c] sm:$0xff]   ;;  %v632_v5 = vld [vmem:[%s822_s1 + $0x34] sm:$0xff]   ;;  %vm97_vm3 = vcmask 588800   ;;  %vm219_vm4 = vcmask 1046528  }
   0x2   :  { %v677_v2 = vld [vmem:[%s822_s1] sm:$0xff]   ;;  %552 = vmatprep.mubr.msk.bf16.mxu0 %vm648_vm0, %v647_v0  ;;  %566 = vmatprep.mubr.msk.bf16.mxu1 %vm648_vm0, %v647_v0  ;;  %v691_v4 = vld [vmem:[%s822_s1 + $0x8] sm:$0xff]   ;;  %v702_v6 = vld [vmem:[%s822_s1 + $0x10] sm:$0xff]  }
   0x3   :  { %543 = vmatpush3.bf16.msra.mxu0 %v628_v1  ;;  %557 = vmatpush3.bf16.msra.mxu1 %v677_v2  ;;  %v634_v7 = vld [vmem:[%s822_s1 + $0x3c] sm:$0xff]   ;;  %v636_v8 = vld [vmem:[%s822_s1 + $0x44] ss:$0 sps:$4 sm:$0xff]   ;;  %v639_v11 = vld [vmem:[%s823_s0 + $0x8] ss:$0 sps:$4 sm:$0x11]  }
   0x4   :  { %544 = vmatprep.subr.bf16.mxu0 %v647_v0  ;;  %558 = vmatprep.subr.bf16.mxu1 %v647_v0  ;;  %v714_v9 = vld [vmem:[%s823_s0] sm:$0xff]   ;;  %v721_v10 = vld [vmem:[%s822_s1 + $0x18] sm:$0xff]   ;;  %v66_v15 = vshll.u32 %v639_v11, 16  ;;  %v103_v17 = vsel %vm101_vm2, %v636_v8, 0  ;;  %v640_v22 = vld [vmem:[%s822_s1 + $0x48] sm:$0xff]   ;;  %v221_v34 = vrot.slane %v639_v11, 1 }
   0x5   :  { %v637_v12 = vld [vmem:[%s822_s1 + $0x20] ss:$0 sps:$4 sm:$0xff]   ;;  %v59_v13 = vshrl.u32 %v714_v9, 16  ;;  %v61_v14 = vshll.u32 %v714_v9, 16  ;;  %v641_v23 = vld [vmem:[%s822_s1 + $0x50] sm:$0xff]   ;;  %v642_v25 = vld [vmem:[%s822_s1 + $0x58] sm:$0xff]  }
   0x6   :  { %v68_v18 = vrot.slane %v66_v15, 1  ;;  %v737_v19 = vsel %vm101_vm2, %v637_v12, 0  ;;  %v645_v24 = vld [vmem:[%s823_s0 + $0xc] sm:$0xff]   ;;  %v646_v26 = vld [vmem:[%s823_s0 + $0x14] ss:$0 sps:$4 sm:$0x11]  }
   0x7   :  { %545 = vmatpush3.bf16.msra.mxu0 %v630_v3  ;;  %559 = vmatpush3.bf16.msra.mxu1 %v691_v4  ;;  %v63_v16 = vrot.slane %v61_v14, 1  ;;  %v322_v27 = vshll.u32 %v645_v24, 16  ;;  %v643_v28 = vld [vmem:[%s822_s1 + $0x60] sm:$0xff]   ;;  %v644_v29 = vld [vmem:[%s822_s1 + $0x68] ss:$0 sps:$4 sm:$0xff]   ;;  %v320_v30 = vshrl.u32 %v645_v24, 16 }
   0x8   :  { %546 = vmatprep.subr.bf16.mxu0 %v647_v0  ;;  %560 = vmatprep.subr.bf16.mxu1 %v647_v0  ;;  %v327_v32 = vshll.u32 %v646_v26, 16  ;;  %v220_v33 = vrot.slane %v714_v9, 1  ;;  %v254_v35 = vsel %vm101_vm2, %v644_v29, 0  ;;  %v418_v40 = vrot.slane %v645_v24, 1  ;;  %v498_v53 = vld [vmem:[%s824_s2] ss:$0 sm:$0xff] }
   0x9   :  { %v64_v20 = vor.u32 %v63_v16, %v59_v13  ;;  %v324_v31 = vrot.slane %v322_v27, 1  ;;  %v419_v41 = vrot.slane %v646_v26, 1 }
   0xa   :  { %v329_v37 = vrot.slane %v327_v32, 1  ;;  %v222_v38 = vsel %vm219_vm4, %v220_v33, %v221_v34 }
   0xb   :  { %547 = vmatpush3.bf16.msra.mxu0 %v632_v5  ;;  %561 = vmatpush3.bf16.msra.mxu1 %v702_v6  ;;  %v69_v21 = vsel %vm57_vm1, %v64_v20, %v68_v18  ;;  %v325_v36 = vor.u32 %v324_v31, %v320_v30  ;;  %v420_v42 = vsel %vm219_vm4, %v418_v40, %v419_v41 }
   0xc   :  { %548 = vmatprep.subr.bf16.mxu0 %v647_v0  ;;  %562 = vmatprep.subr.bf16.mxu1 %v647_v0 }
   0xd   :  { %v330_v39 = vsel %vm57_vm1, %v325_v36, %v329_v37 }
   0xf   :  { %549 = vmatpush3.bf16.msra.mxu0 %v634_v7  ;;  %563 = vmatpush3.bf16.msra.mxu1 %v721_v10 }
  0x10   :  { %550 = vmatprep.subr.bf16.mxu0 %v647_v0  ;;  %564 = vmatprep.subr.bf16.mxu1 %v647_v0 }
  0x13   :  { %551 = vmatpush3.bf16.msra.mxu0 %v103_v17  ;;  %565 = vmatpush3.bf16.msra.mxu1 %v737_v19 }
  0x14   :  { %570 = vmatprep.subr.bf16.mxu0 %v647_v0  ;;  %584 = vmatprep.subr.bf16.mxu1 %v647_v0 }
  0x16   :  { %553 = vmatmul.mubr.msk.bf16.vlgmr.msra.gmra.mrb[0].mxu0 %vm97_vm3, %v69_v21  ;;  %567 = vmatmul.mubr.msk.bf16.vlgmr.msra.gmra.mrb[0].mxu1 %vm97_vm3, %v714_v9 }
  0x17   :  { %571 = vmatpush3.bf16.msra.mxu0 %v640_v22  ;;  %585 = vmatpush3.bf16.msra.mxu1 %v628_v1 }
  0x18   :  { %572 = vmatprep.subr.bf16.mxu0 %v647_v0  ;;  %586 = vmatprep.subr.bf16.mxu1 %v647_v0 }
  0x19   :  { %580 = vmatprep.mubr.msk.bf16.mxu0 %vm648_vm0, %v647_v0  ;;  %594 = vmatprep.mubr.msk.bf16.mxu1 %vm648_vm0, %v647_v0 }
  0x1b   :  { %573 = vmatpush3.bf16.msra.mxu0 %v641_v23  ;;  %587 = vmatpush3.bf16.msra.mxu1 %v630_v3 }
  0x1c   :  { %574 = vmatprep.subr.bf16.mxu0 %v647_v0  ;;  %588 = vmatprep.subr.bf16.mxu1 %v647_v0 }
  0x1f   :  { %575 = vmatpush3.bf16.msra.mxu0 %v642_v25  ;;  %589 = vmatpush3.bf16.msra.mxu1 %v632_v5 }
  0x20   :  { %576 = vmatprep.subr.bf16.mxu0 %v647_v0  ;;  %590 = vmatprep.subr.bf16.mxu1 %v647_v0 }
  0x23   :  { %577 = vmatpush3.bf16.msra.mxu0 %v643_v28  ;;  %591 = vmatpush3.bf16.msra.mxu1 %v634_v7 }
  0x24   :  { %578 = vmatprep.subr.bf16.mxu0 %v647_v0  ;;  %592 = vmatprep.subr.bf16.mxu1 %v647_v0 }
  0x27   :  { %579 = vmatpush3.bf16.msra.mxu0 %v254_v35  ;;  %593 = vmatpush3.bf16.msra.mxu1 %v103_v17 }
  0x28   :  { %598 = vmatprep.subr.bf16.mxu0 %v647_v0  ;;  %612 = vmatprep.subr.bf16.mxu1 %v647_v0 }
  0x2a   :  { %581 = vmatmul.mubr.msk.bf16.vlgmr.msra.gmra.mrb[4].mxu0 %vm97_vm3, %v222_v38  ;;  %595 = vmatmul.mubr.msk.bf16.vlgmr.msra.gmra.mrb[4].mxu1 %vm97_vm3, %v330_v39 }
  0x2b   :  { %599 = vmatpush3.bf16.msra.mxu0 %v677_v2  ;;  %613 = vmatpush3.bf16.msra.mxu1 %v640_v22 }
  0x2c   :  { %600 = vmatprep.subr.bf16.mxu0 %v647_v0  ;;  %614 = vmatprep.subr.bf16.mxu1 %v647_v0 }
  0x2d   :  { %608 = vmatprep.mubr.msk.bf16.mxu0 %vm648_vm0, %v647_v0  ;;  %622 = vmatprep.mubr.msk.bf16.mxu1 %vm648_vm0, %v647_v0 }
  0x2f   :  { %601 = vmatpush3.bf16.msra.mxu0 %v691_v4  ;;  %615 = vmatpush3.bf16.msra.mxu1 %v641_v23 }
  0x30   :  { %602 = vmatprep.subr.bf16.mxu0 %v647_v0  ;;  %616 = vmatprep.subr.bf16.mxu1 %v647_v0 }
  0x33   :  { %603 = vmatpush3.bf16.msra.mxu0 %v702_v6  ;;  %617 = vmatpush3.bf16.msra.mxu1 %v642_v25 }
  0x34   :  { %604 = vmatprep.subr.bf16.mxu0 %v647_v0  ;;  %618 = vmatprep.subr.bf16.mxu1 %v647_v0 }
  0x37   :  { %605 = vmatpush3.bf16.msra.mxu0 %v721_v10  ;;  %619 = vmatpush3.bf16.msra.mxu1 %v643_v28 }
  0x38   :  { %606 = vmatprep.subr.bf16.mxu0 %v647_v0  ;;  %620 = vmatprep.subr.bf16.mxu1 %v647_v0 }
  0x3b   :  { %607 = vmatpush3.bf16.msra.mxu0 %v737_v19  ;;  %621 = vmatpush3.bf16.msra.mxu1 %v254_v35 }
  0x3e   :  { %609 = vmatmul.mubr.msk.bf16.vlgmr.msra.gmra.mrb[8].mxu0 %vm97_vm3, %v645_v24  ;;  %623 = vmatmul.mubr.msk.bf16.vlgmr.msra.gmra.mrb[8].mxu1 %vm97_vm3, %v420_v42 }
  0xe9   :  { %v139_v43 = vpop.f32.mrb[0].mxu0  ;;  %v212_v44 = vpop.f32.mrb[0].mxu1 }
  0xea   :  { %v554_v45 = vpop.f32.mrb[1].mxu0  ;;  %v213_v46 = vadd.f32 %v212_v44, %v139_v43  ;;  %v568_v47 = vpop.f32.mrb[1].mxu1 }
  0xeb   :  { %v142_v48 = vpop.f32.mrb[2].mxu0  ;;  %v215_v49 = vpop.f32.mrb[2].mxu1 }
  0xec   :  { %v555_v50 = vpop.f32.mrb[3].mxu0  ;;  %v216_v51 = vadd.f32 %v215_v49, %v142_v48  ;;  %v569_v52 = vpop.f32.mrb[3].mxu1 }
  0xfd   :  { %v290_v54 = vpop.f32.mrb[4].mxu0  ;;  %v368_v56 = vpop.f32.mrb[4].mxu1 }
  0xfe   :  { %v297_v55 = vadd.f32 %v290_v54, %v213_v46  ;;  %v582_v57 = vpop.f32.mrb[5].mxu0  ;;  %v596_v58 = vpop.f32.mrb[5].mxu1 }
  0xff   :  { %v293_v59 = vpop.f32.mrb[6].mxu0  ;;  %v371_v62 = vpop.f32.mrb[6].mxu1 }
 0x100   :  { %v305_v60 = vadd.f32 %v498_v53, %v297_v55  ;;  %v298_v61 = vadd.f32 %v293_v59, %v216_v51  ;;  %v583_v63 = vpop.f32.mrb[7].mxu0  ;;  %v597_v0 = vpop.f32.mrb[7].mxu1 }
 0x102   :  { %v307_v1 = vmax.f32 %v305_v60, 0.0  ;;  %v306_v2 = vadd.f32 %v498_v53, %v298_v61 }
 0x104   :  { %309 = vst [vmem:[%s825_s3] sm:$0xff] %v307_v1  ;;  %v308_v3 = vmax.f32 %v306_v2, 0.0 }
 0x106   :  { %310 = vst [vmem:[%s825_s3 + $0x8] sm:$0xff] %v308_v3 }
 0x111   :  { %v411_v4 = vpop.f32.mrb[8].mxu0  ;;  %v458_v6 = vpop.f32.mrb[8].mxu1 }
 0x112   :  { %v412_v5 = vadd.f32 %v411_v4, %v368_v56  ;;  %v610_v7 = vpop.f32.mrb[9].mxu0  ;;  %v624_v8 = vpop.f32.mrb[9].mxu1 }
 0x113   :  { %v414_v9 = vpop.f32.mrb[10].mxu0  ;;  %v461_v12 = vpop.f32.mrb[10].mxu1 }
 0x114   :  { %v465_v10 = vadd.f32 %v458_v6, %v412_v5  ;;  %v415_v11 = vadd.f32 %v414_v9, %v371_v62  ;;  %v611_v13 = vpop.f32.mrb[11].mxu0  ;;  %v625_v14 = vpop.f32.mrb[11].mxu1 }
 0x116   :  { %v467_v15 = vadd.f32 %v498_v53, %v465_v10  ;;  %v466_v16 = vadd.f32 %v461_v12, %v415_v11 }
 0x118   :  { %v469_v17 = vmax.f32 %v467_v15, 0.0  ;;  %v468_v18 = vadd.f32 %v498_v53, %v466_v16 }
 0x11a   :  { %504 = vst [vmem:[%s825_s3 + $0x10] sm:$0xff] %v469_v17  ;;  %v470_v19 = vmax.f32 %v468_v18, 0.0 }
 0x11c   :  { %505 = vst [vmem:[%s825_s3 + $0x18] sm:$0xff] %v470_v19 }

</bundles_post_ra>
